<compile_context>
chip_gen: v7x
topology: tpu7x:2x2x1
jax: 0.10.0
libtpu: 0.0.40
codegen_flags: <defaults>
</compile_context>

<pallas_src>
import jax
import jax.numpy as jnp
from jax.experimental import pallas as pl
from jax.experimental.pallas import tpu as pltpu

LATENT_DIM = 64
HIDDEN1 = 200
HIDDEN2 = 100
TARGET_DIM = 20

H1_PAD = 256          # 200 -> 2 full lane tiles
H2_PAD = 128          # 100 -> 1 full lane tile
LN_EPS = 1e-5


def _round_up(n, m):
    return ((n + m - 1) // m) * m


def _layernorm(h, gamma, beta, n_true):
    # One-pass statistics with the TRUE feature count (padded lanes are exactly 0
    # and gamma/beta padding is 0, so they drop out of sums and of the output).
    # rsqrt goes to the EUP slot; the two cross-lane reductions go to the XLU.
    inv_n = 1.0 / float(n_true)
    m1 = jnp.sum(h, axis=-1, keepdims=True) * inv_n
    m2 = jnp.sum(h * h, axis=-1, keepdims=True) * inv_n
    var = m2 - m1 * m1
    return (h - m1) * jax.lax.rsqrt(var + LN_EPS) * gamma + beta


def decoder_kernel(x_ref, w1_ref, w2_ref, w3_ref, p_ref, out_ref):
    # Matmul inputs in the weight (compute) dtype, f32 accumulation; all
    # elementwise / LayerNorm work stays in f32.
    cd = w1_ref.dtype
    x = x_ref[...].astype(cd)                       # (bm, 64)

    # Packed resident parameter slab (8, 256) f32:
    #   row 0..2: b1 / gamma1 / beta1   (true width 200, zero padded)
    #   row 3..5: b2 / gamma2 / beta2   (true width 100, zero padded)
    #   row 6   : b3                    (true width 20)
    b1 = p_ref[0:1, :]                              # (1, 256)
    g1 = p_ref[1:2, :]
    be1 = p_ref[2:3, :]
    b2 = p_ref[3:4, :H2_PAD]                        # (1, 128)
    g2 = p_ref[4:5, :H2_PAD]
    be2 = p_ref[5:6, :H2_PAD]
    b3 = p_ref[6:7, :TARGET_DIM]                    # (1, 20)

    # Linear(64, 200->256) + LayerNorm(200) + ReLU
    h = jnp.dot(x, w1_ref[...], preferred_element_type=jnp.float32) + b1
    h = jnp.maximum(_layernorm(h, g1, be1, HIDDEN1), 0.0)

    # Linear(200->256, 100->128) + LayerNorm(100) + ReLU
    h = jnp.dot(h.astype(cd), w2_ref[...], preferred_element_type=jnp.float32) + b2
    h = jnp.maximum(_layernorm(h, g2, be2, HIDDEN2), 0.0)

    # Linear(100->128, 20): narrow output written directly (no padded writeback).
    out = jnp.dot(h.astype(cd), w3_ref[...], preferred_element_type=jnp.float32) + b3
    out_ref[...] = out.astype(out_ref.dtype)


def prepare_params(params, compute_dtype=jnp.bfloat16):
    """One-time weight prep (padding + dtype cast). Keep out of the per-call path."""
    w1 = jnp.zeros((LATENT_DIM, H1_PAD), compute_dtype)
    w1 = w1.at[:, :HIDDEN1].set(params["w1"].astype(compute_dtype))
    w2 = jnp.zeros((H1_PAD, H2_PAD), compute_dtype)
    w2 = w2.at[:HIDDEN1, :HIDDEN2].set(params["w2"].astype(compute_dtype))
    w3 = jnp.zeros((H2_PAD, TARGET_DIM), compute_dtype)
    w3 = w3.at[:HIDDEN2, :].set(params["w3"].astype(compute_dtype))

    slab = jnp.zeros((8, H1_PAD), jnp.float32)
    slab = slab.at[0, :HIDDEN1].set(params["b1"].reshape(-1))
    slab = slab.at[1, :HIDDEN1].set(params["g1"].reshape(-1))
    slab = slab.at[2, :HIDDEN1].set(params["be1"].reshape(-1))
    slab = slab.at[3, :HIDDEN2].set(params["b2"].reshape(-1))
    slab = slab.at[4, :HIDDEN2].set(params["g2"].reshape(-1))
    slab = slab.at[5, :HIDDEN2].set(params["be2"].reshape(-1))
    slab = slab.at[6, :TARGET_DIM].set(params["b3"].reshape(-1))
    return (w1, w2, w3, slab)


def decoder_forward(x, prepared, *, block_m=2048):
    """x: (B, LATENT_DIM). Returns (B, TARGET_DIM) float32."""
    w1, w2, w3, slab = prepared
    B = x.shape[0]

    # Batch tile: big (amortizes ~0.35us/step pipeline overhead) but bounded so
    # double-buffered x/out tiles + f32 intermediates stay well inside VMEM on
    # every generation (v7x: 64 MiB physical per TC).
    bm = min(min(block_m, 4096), _round_up(B, 8))
    # v7x megacore: make sure the "parallel" batch axis has >= 2 steps to shard
    # across both TensorCores whenever there is enough work to split.
    if B >= 256 and pl.cdiv(B, bm) < 2:
        bm = _round_up(pl.cdiv(B, 2), 8)
    grid = (pl.cdiv(B, bm),)   # ragged last tile handled by Pallas (no x pad copy)

    # ~4 KB of VMEM per tile row (x/out double buffers + f32/bf16 intermediates).
    vmem_est = bm * 4608 + (2 << 20)
    vmem_limit = int(min(max(2 * vmem_est, 32 << 20), 48 << 20))

    def resident(shape):
        # Full-array block, same block index every grid step -> DMA'd once,
        # stays VMEM-resident across the batch loop.
        return pl.BlockSpec(shape, lambda i: (0, 0))

    in_specs = [
        pl.BlockSpec((bm, LATENT_DIM), lambda i: (i, 0)),   # x tile (pipelined)
        resident((LATENT_DIM, H1_PAD)),                     # w1
        resident((H1_PAD, H2_PAD)),                         # w2
        resident((H2_PAD, TARGET_DIM)),                     # w3
        resident((8, H1_PAD)),                              # packed bias/LN slab
    ]

    itemsize = jnp.dtype(x.dtype).itemsize
    cost = pl.CostEstimate(
        flops=2 * B * (LATENT_DIM * H1_PAD + H1_PAD * H2_PAD + H2_PAD * TARGET_DIM),
        transcendentals=2 * B,
        bytes_accessed=B * (LATENT_DIM * itemsize + TARGET_DIM * 4)
        + w1.size * 2 + w2.size * 2 + w3.size * 2 + slab.size * 4,
    )

    return pl.pallas_call(
        decoder_kernel,
        out_shape=jax.ShapeDtypeStruct((B, TARGET_DIM), jnp.float32),
        grid=grid,
        in_specs=in_specs,
        out_specs=pl.BlockSpec((bm, TARGET_DIM), lambda i: (i, 0)),
        compiler_params=pltpu.CompilerParams(
            dimension_semantics=("parallel",),   # shard batch tiles across TCs on v7x
            vmem_limit_bytes=vmem_limit,
        ),
        cost_estimate=cost,
    )(x, w1, w2, w3, slab)


def init_params(key):
    """Deterministic synthetic parameters matching nn.Linear / nn.LayerNorm shapes.

    Linear weights are stored as (in_features, out_features) (transpose of PyTorch's
    (out, in)) so the kernel computes x @ W directly. Biases / LN params are (1, N).
    """
    ks = jax.random.split(key, 6)

    def linear(kw, kb, fan_in, fan_out):
        bound = 1.0 / jnp.sqrt(fan_in)
        w = jax.random.uniform(kw, (fan_in, fan_out), jnp.float32, -bound, bound)
        b = jax.random.uniform(kb, (1, fan_out), jnp.float32, -bound, bound)
        return w, b

    w1, b1 = linear(ks[0], ks[1], LATENT_DIM, HIDDEN1)
    w2, b2 = linear(ks[2], ks[3], HIDDEN1, HIDDEN2)
    w3, b3 = linear(ks[4], ks[5], HIDDEN2, TARGET_DIM)

    return {
        "w1": w1, "b1": b1,
        "g1": jnp.ones((1, HIDDEN1), jnp.float32), "be1": jnp.zeros((1, HIDDEN1), jnp.float32),
        "w2": w2, "b2": b2,
        "g2": jnp.ones((1, HIDDEN2), jnp.float32), "be2": jnp.zeros((1, HIDDEN2), jnp.float32),
        "w3": w3, "b3": b3,
    }


def decoder_ref(x, p, compute_dtype=jnp.bfloat16):
    """Pure-JAX reference with the same mixed-precision contract as the kernel."""
    cd = compute_dtype

    def ln(h, g, b):
        m = jnp.mean(h, axis=-1, keepdims=True)
        v = jnp.mean(h * h, axis=-1, keepdims=True) - m * m
        return (h - m) * jax.lax.rsqrt(v + LN_EPS) * g + b

    h = jnp.dot(x.astype(cd), p["w1"].astype(cd), preferred_element_type=jnp.float32) + p["b1"]
    h = jnp.maximum(ln(h, p["g1"], p["be1"]), 0.0)
    h = jnp.dot(h.astype(cd), p["w2"].astype(cd), preferred_element_type=jnp.float32) + p["b2"]
    h = jnp.maximum(ln(h, p["g2"], p["be2"]), 0.0)
    return jnp.dot(h.astype(cd), p["w3"].astype(cd), preferred_element_type=jnp.float32) + p["b3"]


if __name__ == "__main__":
    key = jax.random.PRNGKey(0)
    kx, kp = jax.random.split(key)
    params = init_params(kp)
    prepared = prepare_params(params)

    # Small shape consistent with the module (Decoder: latent_dim=64 -> target_dim=20).
    batch = 8
    x = jax.random.normal(kx, (batch, LATENT_DIM), jnp.float32)
    out = jax.block_until_ready(decoder_forward(x, prepared))
    ref = decoder_ref(x, params)
    assert out.shape == (batch, TARGET_DIM), out.shape
    assert jnp.allclose(out, ref, atol=3e-3, rtol=3e-3), float(jnp.max(jnp.abs(out - ref)))

    # Ragged batch: exercises >=2 grid steps + masked last-tile writes, no x padding.
    batch2 = 300
    x2 = jax.random.normal(kx, (batch2, LATENT_DIM), jnp.float32)
    out2 = jax.block_until_ready(decoder_forward(x2, prepared))
    ref2 = decoder_ref(x2, params)
    assert out2.shape == (batch2, TARGET_DIM), out2.shape
    assert jnp.allclose(out2, ref2, atol=3e-3, rtol=3e-3), float(jnp.max(jnp.abs(out2 - ref2)))

    # Explicit small tile: grid=3 with a ragged last tile.
    out3 = jax.block_until_ready(decoder_forward(x2, prepared, block_m=128))
    assert jnp.allclose(out3, ref2, atol=3e-3, rtol=3e-3), float(jnp.max(jnp.abs(out3 - ref2)))

    print("KERNEL_OK")
</pallas_src>

<mosaic_0001>
module attributes {stable_mosaic.version = 11 : i64} {
  func.func @decoder_kernel(%arg0: i32, %arg1: memref<8x64xf32, #tpu.memory_space<vmem>>, %arg2: memref<64x256xbf16, #tpu.memory_space<vmem>>, %arg3: memref<256x128xbf16, #tpu.memory_space<vmem>>, %arg4: memref<128x20xbf16, #tpu.memory_space<vmem>>, %arg5: memref<8x256xf32, #tpu.memory_space<vmem>>, %arg6: memref<8x20xf32, #tpu.memory_space<vmem>>) attributes {dimension_semantics = [#tpu.dimension_semantics<parallel>], iteration_bounds = array<i64: 1>, scalar_prefetch = 0 : i64, scratch_operands = 0 : i64, tpu.core_type = #tpu.core_type<tc>, window_params = [{transform_indices = @transform_0, window_bounds = array<i64: 8, 64>}, {pipeline_mode = #tpu.pipeline_mode<synchronous>, transform_indices = @transform_1, window_bounds = array<i64: 64, 256>}, {pipeline_mode = #tpu.pipeline_mode<synchronous>, transform_indices = @transform_2, window_bounds = array<i64: 256, 128>}, {pipeline_mode = #tpu.pipeline_mode<synchronous>, transform_indices = @transform_3, window_bounds = array<i64: 128, 20>}, {pipeline_mode = #tpu.pipeline_mode<synchronous>, transform_indices = @transform_4, window_bounds = array<i64: 8, 256>}, {transform_indices = @transform_5, window_bounds = array<i64: 8, 20>}]} {
    %c0 = arith.constant 0 : index
    %c0_0 = arith.constant 0 : index
    %0 = vector.load %arg1[%c0, %c0_0] : memref<8x64xf32, #tpu.memory_space<vmem>>, vector<8x64xf32>
    %1 = arith.truncf %0 : vector<8x64xf32> to vector<8x64xbf16>
    %c0_1 = arith.constant 0 : index
    %c0_2 = arith.constant 0 : index
    %2 = vector.load %arg5[%c0_1, %c0_2] : memref<8x256xf32, #tpu.memory_space<vmem>>, vector<1x256xf32>
    %c1 = arith.constant 1 : index
    %c0_3 = arith.constant 0 : index
    %3 = vector.load %arg5[%c1, %c0_3] : memref<8x256xf32, #tpu.memory_space<vmem>>, vector<1x256xf32>
    %c2 = arith.constant 2 : index
    %c0_4 = arith.constant 0 : index
    %4 = vector.load %arg5[%c2, %c0_4] : memref<8x256xf32, #tpu.memory_space<vmem>>, vector<1x256xf32>
    %c3 = arith.constant 3 : index
    %c0_5 = arith.constant 0 : index
    %5 = vector.load %arg5[%c3, %c0_5] : memref<8x256xf32, #tpu.memory_space<vmem>>, vector<1x128xf32>
    %c4 = arith.constant 4 : index
    %c0_6 = arith.constant 0 : index
    %6 = vector.load %arg5[%c4, %c0_6] : memref<8x256xf32, #tpu.memory_space<vmem>>, vector<1x128xf32>
    %c5 = arith.constant 5 : index
    %c0_7 = arith.constant 0 : index
    %7 = vector.load %arg5[%c5, %c0_7] : memref<8x256xf32, #tpu.memory_space<vmem>>, vector<1x128xf32>
    %c6 = arith.constant 6 : index
    %c0_8 = arith.constant 0 : index
    %8 = vector.load %arg5[%c6, %c0_8] : memref<8x256xf32, #tpu.memory_space<vmem>>, vector<1x20xf32>
    %c0_9 = arith.constant 0 : index
    %c0_10 = arith.constant 0 : index
    %9 = vector.load %arg2[%c0_9, %c0_10] : memref<64x256xbf16, #tpu.memory_space<vmem>>, vector<64x256xbf16>
    %cst = arith.constant dense<0.000000e+00> : vector<8x256xf32>
    %10 = tpu.matmul %1, %9, %cst {dimension_numbers = #tpu.dot_dimension_numbers<[1], [0], [0], [1], [0, 0, 1, 1], [], []>} : vector<8x64xbf16>, vector<64x256xbf16>, vector<8x256xf32> -> vector<8x256xf32>
    %11 = vector.broadcast %2 : vector<1x256xf32> to vector<8x256xf32>
    %12 = arith.addf %10, %11 : vector<8x256xf32>
    %cst_11 = arith.constant dense<0.000000e+00> : vector<8xf32>
    %13 = vector.multi_reduction <add>, %12, %cst_11 [1] : vector<8x256xf32> to vector<8xf32>
    %14 = vector.shape_cast %13 : vector<8xf32> to vector<8x1xf32>
    %cst_12 = arith.constant 5.000000e-03 : f32
    %15 = vector.broadcast %cst_12 : f32 to vector<8x1xf32>
    %16 = arith.mulf %14, %15 : vector<8x1xf32>
    %17 = arith.mulf %12, %12 : vector<8x256xf32>
    %cst_13 = arith.constant dense<0.000000e+00> : vector<8xf32>
    %18 = vector.multi_reduction <add>, %17, %cst_13 [1] : vector<8x256xf32> to vector<8xf32>
    %19 = vector.shape_cast %18 : vector<8xf32> to vector<8x1xf32>
    %cst_14 = arith.constant 5.000000e-03 : f32
    %20 = vector.broadcast %cst_14 : f32 to vector<8x1xf32>
    %21 = arith.mulf %19, %20 : vector<8x1xf32>
    %22 = arith.mulf %16, %16 : vector<8x1xf32>
    %23 = arith.subf %21, %22 : vector<8x1xf32>
    %24 = vector.broadcast %16 : vector<8x1xf32> to vector<8x256xf32>
    %25 = arith.subf %12, %24 : vector<8x256xf32>
    %cst_15 = arith.constant 9.99999974E-6 : f32
    %26 = vector.broadcast %cst_15 : f32 to vector<8x1xf32>
    %27 = arith.addf %23, %26 : vector<8x1xf32>
    %28 = math.rsqrt %27 : vector<8x1xf32>
    %29 = vector.broadcast %28 : vector<8x1xf32> to vector<8x256xf32>
    %30 = arith.mulf %25, %29 : vector<8x256xf32>
    %31 = vector.broadcast %3 : vector<1x256xf32> to vector<8x256xf32>
    %32 = arith.mulf %30, %31 : vector<8x256xf32>
    %33 = vector.broadcast %4 : vector<1x256xf32> to vector<8x256xf32>
    %34 = arith.addf %32, %33 : vector<8x256xf32>
    %cst_16 = arith.constant 0.000000e+00 : f32
    %35 = vector.broadcast %cst_16 : f32 to vector<8x256xf32>
    %36 = arith.maximumf %34, %35 : vector<8x256xf32>
    %37 = arith.truncf %36 : vector<8x256xf32> to vector<8x256xbf16>
    %c0_17 = arith.constant 0 : index
    %c0_18 = arith.constant 0 : index
    %38 = vector.load %arg3[%c0_17, %c0_18] : memref<256x128xbf16, #tpu.memory_space<vmem>>, vector<256x128xbf16>
    %cst_19 = arith.constant dense<0.000000e+00> : vector<8x128xf32>
    %39 = tpu.matmul %37, %38, %cst_19 {dimension_numbers = #tpu.dot_dimension_numbers<[1], [0], [0], [1], [0, 0, 1, 1], [], []>} : vector<8x256xbf16>, vector<256x128xbf16>, vector<8x128xf32> -> vector<8x128xf32>
    %40 = vector.broadcast %5 : vector<1x128xf32> to vector<8x128xf32>
    %41 = arith.addf %39, %40 : vector<8x128xf32>
    %cst_20 = arith.constant dense<0.000000e+00> : vector<8xf32>
    %42 = vector.multi_reduction <add>, %41, %cst_20 [1] : vector<8x128xf32> to vector<8xf32>
    %43 = vector.shape_cast %42 : vector<8xf32> to vector<8x1xf32>
    %cst_21 = arith.constant 0.00999999977 : f32
    %44 = vector.broadcast %cst_21 : f32 to vector<8x1xf32>
    %45 = arith.mulf %43, %44 : vector<8x1xf32>
    %46 = arith.mulf %41, %41 : vector<8x128xf32>
    %cst_22 = arith.constant dense<0.000000e+00> : vector<8xf32>
    %47 = vector.multi_reduction <add>, %46, %cst_22 [1] : vector<8x128xf32> to vector<8xf32>
    %48 = vector.shape_cast %47 : vector<8xf32> to vector<8x1xf32>
    %cst_23 = arith.constant 0.00999999977 : f32
    %49 = vector.broadcast %cst_23 : f32 to vector<8x1xf32>
    %50 = arith.mulf %48, %49 : vector<8x1xf32>
    %51 = arith.mulf %45, %45 : vector<8x1xf32>
    %52 = arith.subf %50, %51 : vector<8x1xf32>
    %53 = vector.broadcast %45 : vector<8x1xf32> to vector<8x128xf32>
    %54 = arith.subf %41, %53 : vector<8x128xf32>
    %cst_24 = arith.constant 9.99999974E-6 : f32
    %55 = vector.broadcast %cst_24 : f32 to vector<8x1xf32>
    %56 = arith.addf %52, %55 : vector<8x1xf32>
    %57 = math.rsqrt %56 : vector<8x1xf32>
    %58 = vector.broadcast %57 : vector<8x1xf32> to vector<8x128xf32>
    %59 = arith.mulf %54, %58 : vector<8x128xf32>
    %60 = vector.broadcast %6 : vector<1x128xf32> to vector<8x128xf32>
    %61 = arith.mulf %59, %60 : vector<8x128xf32>
    %62 = vector.broadcast %7 : vector<1x128xf32> to vector<8x128xf32>
    %63 = arith.addf %61, %62 : vector<8x128xf32>
    %cst_25 = arith.constant 0.000000e+00 : f32
    %64 = vector.broadcast %cst_25 : f32 to vector<8x128xf32>
    %65 = arith.maximumf %63, %64 : vector<8x128xf32>
    %66 = arith.truncf %65 : vector<8x128xf32> to vector<8x128xbf16>
    %c0_26 = arith.constant 0 : index
    %c0_27 = arith.constant 0 : index
    %67 = vector.load %arg4[%c0_26, %c0_27] : memref<128x20xbf16, #tpu.memory_space<vmem>>, vector<128x20xbf16>
    %cst_28 = arith.constant dense<0.000000e+00> : vector<8x20xf32>
    %68 = tpu.matmul %66, %67, %cst_28 {dimension_numbers = #tpu.dot_dimension_numbers<[1], [0], [0], [1], [0, 0, 1, 1], [], []>} : vector<8x128xbf16>, vector<128x20xbf16>, vector<8x20xf32> -> vector<8x20xf32>
    %69 = vector.broadcast %8 : vector<1x20xf32> to vector<8x20xf32>
    %70 = arith.addf %68, %69 : vector<8x20xf32>
    %c0_29 = arith.constant 0 : index
    %c0_30 = arith.constant 0 : index
    %71 = vector.load %arg6[%c0_29, %c0_30] : memref<8x20xf32, #tpu.memory_space<vmem>>, vector<8x20xf32>
    tpu.vector_store %arg6[%c0_29, %c0_30], %70 {strides = array<i32>} : memref<8x20xf32, #tpu.memory_space<vmem>>, vector<8x20xf32>,
    return
  }
  func.func @transform_0(%arg0: i32) -> (i32, i32) {
    %c0_i32 = arith.constant 0 : i32
    %c0_i32_0 = arith.constant 0 : i32
    return %arg0, %c0_i32 : i32, i32
  }
  func.func @transform_1(%arg0: i32) -> (i32, i32) {
    %c0_i32 = arith.constant 0 : i32
    %c0_i32_0 = arith.constant 0 : i32
    %c0_i32_1 = arith.constant 0 : i32
    return %c0_i32, %c0_i32_0 : i32, i32
  }
  func.func @transform_2(%arg0: i32) -> (i32, i32) {
    %c0_i32 = arith.constant 0 : i32
    %c0_i32_0 = arith.constant 0 : i32
    %c0_i32_1 = arith.constant 0 : i32
    return %c0_i32, %c0_i32_0 : i32, i32
  }
  func.func @transform_3(%arg0: i32) -> (i32, i32) {
    %c0_i32 = arith.constant 0 : i32
    %c0_i32_0 = arith.constant 0 : i32
    %c0_i32_1 = arith.constant 0 : i32
    return %c0_i32, %c0_i32_0 : i32, i32
  }
  func.func @transform_4(%arg0: i32) -> (i32, i32) {
    %c0_i32 = arith.constant 0 : i32
    %c0_i32_0 = arith.constant 0 : i32
    %c0_i32_1 = arith.constant 0 : i32
    return %c0_i32, %c0_i32_0 : i32, i32
  }
  func.func @transform_5(%arg0: i32) -> (i32, i32) {
    %c0_i32 = arith.constant 0 : i32
    %c0_i32_0 = arith.constant 0 : i32
    return %arg0, %c0_i32 : i32, i32
  }
}

</mosaic_0001>

<bundles_post_ra>
// kernel: tpu_custom_call.1
= control target key start
LH: loop header
LB: loop body
LE: loop exit
PB: predicated region body
PF: predicated region fallthrough
CT: control target
= control target key end

     0   :  { %10 = vsyncpa [#allocation3], 0  ;;  %s884_s0 = inlined_call_operand.hbm [shape: f32[8,64], index: 0, kind: input, shape index: {}]   ;;  %s885_s1 = inlined_call_operand.vmem [shape: bf16[64,256], index: 1, kind: input, shape index: {}]   ;;  %s886_s2 = inlined_call_operand.hbm [shape: bf16[256,128], index: 2, kind: input, shape index: {}]   ;;  %s887_s3 = inlined_call_operand.vmem [shape: bf16[128,20], index: 3, kind: input, shape index: {}]   ;;  %s888_s4 = inlined_call_operand.vmem [shape: f32[8,256], index: 4, kind: input, shape index: {}]   ;;  %s889_s5 = inlined_call_operand.hbm [shape: f32[8,20], index: 5, kind: output, shape index: {}]  }
   0x1   :  { %11 = vsyncpa [#allocation6], 0 }
   0x2   :  { %12 = vsyncpa [#allocation4], 0  ;;  %s724_s18 = smov [#allocation2]   ;;  %s725_s20 = smov [#allocation5]  }
   0x3   :  { %s19_s19 = sshll.u32 %s724_s18, 4  ;;  %s30_s21 = sshll.u32 %s725_s20, 4  ;;  %s20_s19 = int_to_ptr.vmem [resolvable:$true] %s19_s19  ;;  %s762_s21 = int_to_ptr.vmem [resolvable:$true] %s30_s21 }
   0x4   :  { %s652_s24 = scalar_lea.hbm %s884_s0, 128 }
   0x5   :  { %p653_p0 = scmp.ne.s32.totalorder %s884_s0, %s652_s24  ;;  %p656_p1 = scmp.lt.u32.totalorder %s652_s24, %s884_s0 }
   0x7   :  { %p658_p2 = pnand %p656_p1, %p653_p0 }
   0x9   :  { %661 = shalt.err (!%p658_p2)
}
   0xa   :  { %s662_s29 = scalar_lea.vmem %s20_s19, 128  ;;  %p667_p4 = scmp.lt.s32.totalorder %s20_s19, %s20_s19 }
   0xb   :  { %p663_p3 = scmp.ne.s32.totalorder %s20_s19, %s662_s29  ;;  %p668_p5 = scmp.lt.s32.totalorder %s662_s29, %s662_s29 }
   0xd   :  { %p669_p6 = por %p668_p5, %p667_p4 }
   0xf   :  { %p670_p7 = pnand %p669_p6, %p663_p3 }
  0x11   :  { %673 = shalt.err (!%p670_p7)
}
  0x12   :  { %22 = dma.hbm_to_vmem [thread:$0]  %s884_s0, 128, %s20_s19, [#allocation3]  }
  0x13   :  { %s674_s9 = scalar_lea.hbm %s886_s2, 2048 }
  0x14   :  { %p675_p8 = scmp.ne.s32.totalorder %s886_s2, %s674_s9  ;;  %p678_p9 = scmp.lt.u32.totalorder %s674_s9, %s886_s2 }
  0x16   :  { %p680_p10 = pnand %p678_p9, %p675_p8 }
  0x18   :  { %683 = shalt.err (!%p680_p10)
}
  0x19   :  { %s684_s14 = scalar_lea.vmem %s762_s21, 2048  ;;  %p689_p12 = scmp.lt.s32.totalorder %s762_s21, %s762_s21 }
  0x1a   :  { %p685_p11 = scmp.ne.s32.totalorder %s762_s21, %s684_s14  ;;  %p690_p13 = scmp.lt.s32.totalorder %s684_s14, %s684_s14 }
  0x1c   :  { %p691_p0 = por %p690_p13, %p689_p12 }
  0x1e   :  { %p692_p1 = pnand %p691_p0, %p685_p11 }
  0x20   :  { %695 = shalt.err (!%p692_p1)
}
  0x21   :  { %s726_s0 = smov 64   ;;  %s727_s15 = smov 4  }
  0x22   :  { %36 = dma.hbm_to_vmem [thread:$0]  %s886_s2, 2048, %s762_s21, [#allocation6], %s726_s0, %s726_s0, %s727_s15  }
  0x23   :  { %718 = dma.done.wait [#allocation3], 128  }
  0x24   :  { %719 = vsyncadd [#allocation3], 4294967168 }
  0x25   :  { %720 = dma.done.wait [#allocation6], 2048  }
  0x26   :  { %721 = vsyncadd [#allocation6], 4294965248  ;;  %v728_v0 = vmov 0   ;;  %v612_v1 = vld [vmem:[%s885_s1 + $0x4] ss:$8 sps:$4 sm:$0xff]   ;;  %vm118_vm0 = vcmask 523264   ;;  %v68_v11 = vlaneseq }
  0x27   :  { %154 = vmatprep.mubr.bf16.mxu0 %v728_v0  ;;  %v614_v2 = vld [vmem:[%s885_s1] ss:$8 sps:$4 sm:$0xff]   ;;  %122 = vmatprep.subr.bf16.mxu0 %v612_v1  ;;  %v615_v3 = vld [vmem:[%s885_s1 + $0x14] ss:$8 sps:$4 sm:$0xff]   ;;  %v617_v4 = vld [vmem:[%s885_s1 + $0x10] ss:$8 sps:$4 sm:$0xff]  }
  0x28   :  { %123 = vmatpush1.bf16.msra.mxu0 %v614_v2  ;;  %v618_v5 = vld [vmem:[%s885_s1 + $0x24] ss:$8 sps:$4 sm:$0xff]   ;;  %v620_v6 = vld [vmem:[%s885_s1 + $0x20] ss:$8 sps:$4 sm:$0xff]   ;;  %v621_v7 = vld [vmem:[%s885_s1 + $0x34] ss:$8 sps:$4 sm:$0xff]  }
  0x29   :  { %124 = vmatprep.subr.bf16.mxu0 %v615_v3  ;;  %v623_v8 = vld [vmem:[%s885_s1 + $0x30] ss:$8 sps:$4 sm:$0xff]   ;;  %v48_v9 = vld [vmem:[#allocation2] sm:$0xff]  ;;  %v69_v12 = vshrl.u32 %v68_v11, 7  ;;  %v624_v28 = vld [vmem:[#allocation5 + $0x40] sm:$0xff]   ;;  %vm730_vm1 = vmmov 0  }
  0x2a   :  { %v49_v10 = vpack.c.bf16 %v48_v9, %v48_v9  ;;  %v50_v14 = vld [vmem:[%s888_s4] ss:$8 sm:$0x3]  ;;  %553 = vmatprep.subr.bf16.mxu1 %v624_v28  ;;  %v626_v30 = vld [vmem:[#allocation5 + $0x48] sm:$0xff]   ;;  %v628_v32 = vld [vmem:[#allocation5 + $0x50] sm:$0xff]   ;;  %s731_s9 = smov [#allocation7]  }
  0x2b   :  { %v817_v13 = vsub.s32 0, %v69_v12  ;;  %v822_v15 = vsub.s32 1, %v69_v12  ;;  %v625_v29 = vld [vmem:[#allocation5] sm:$0xff]   ;;  %v627_v31 = vld [vmem:[#allocation5 + $0x8] sm:$0xff]   ;;  %v629_v33 = vld [vmem:[#allocation5 + $0x10] sm:$0xff]   ;;  %s508_s1 = sshll.u32 %s731_s9, 4  ;;  %s509_s1 = int_to_ptr.vmem [resolvable:$true] %s508_s1 }
  0x2c   :  { %125 = vmatpush1.bf16.msra.mxu0 %v617_v4  ;;  %554 = vmatpush3.bf16.msra.mxu1 %v625_v29  ;;  %v630_v34 = vld [vmem:[#allocation5 + $0x58] sm:$0xff]   ;;  %v632_v36 = vld [vmem:[#allocation5 + $0x60] sm:$0xff]   ;;  %v634_v38 = vld [vmem:[#allocation5 + $0x68] sm:$0xff]   ;;  %vm500_vm2 = vcmask 162816   ;;  %s696_s10 = scalar_lea.vmem %s509_s1, 128  ;;  %p701_p3 = scmp.lt.s32.totalorder %s509_s1, %s509_s1 }
  0x2d   :  { %126 = vmatprep.subr.bf16.mxu0 %v618_v5  ;;  %v71_v16 = vrot.slane %v50_v14, %v817_v13  ;;  %v75_v17 = vrot.slane %v50_v14, %v822_v15  ;;  %555 = vmatprep.subr.bf16.mxu1 %v626_v30  ;;  %v631_v35 = vld [vmem:[#allocation5 + $0x18] sm:$0xff]   ;;  %v633_v37 = vld [vmem:[#allocation5 + $0x20] sm:$0xff]   ;;  %v635_v39 = vld [vmem:[#allocation5 + $0x28] sm:$0xff]   ;;  %p697_p2 = scmp.ne.s32.totalorder %s509_s1, %s696_s10  ;;  %p702_p4 = scmp.lt.s32.totalorder %s696_s10, %s696_s10 }
  0x2e   :  { %v636_v40 = vld [vmem:[#allocation5 + $0x70] sm:$0xff]   ;;  %v638_v42 = vld [vmem:[#allocation5 + $0x78] sm:$0xff]  }
  0x2f   :  { %v637_v41 = vld [vmem:[#allocation5 + $0x30] sm:$0xff]   ;;  %v639_v43 = vld [vmem:[#allocation5 + $0x38] sm:$0xff]   ;;  %p703_p5 = por %p702_p4, %p701_p3 }
  0x30   :  { %127 = vmatpush1.bf16.msra.mxu0 %v620_v6  ;;  %556 = vmatpush3.bf16.msra.mxu1 %v627_v31  ;;  %v518_v51 = vld [vmem:[%s888_s4 + $0x1] ss:$8 sm:$0x3]  ;;  %v519_v52 = vld [vmem:[%s888_s4 + $0x2] ss:$8 sm:$0x3] }
  0x31   :  { %128 = vmatprep.subr.bf16.mxu0 %v621_v7  ;;  %557 = vmatprep.subr.bf16.mxu1 %v628_v32  ;;  %v185_v55 = vrot.slane %v518_v51, %v817_v13  ;;  %v189_v56 = vrot.slane %v518_v51, %v822_v15  ;;  %v198_v59 = vrot.slane %v519_v52, %v817_v13  ;;  %v729_v6 = vmov 0.0   ;;  %v56_v32 = vld [vmem:[%s888_s4 + $0x4] ss:$0 sm:$0xff]  ;;  %p704_p6 = pnand %p703_p5, %p697_p2 }
  0x32   :  { %v202_v60 = vrot.slane %v519_v52, %v822_v15  ;;  %v640_v15 = vld [vmem:[%s887_s3] sm:$0xff]  }
  0x34   :  { %129 = vmatpush1.bf16.msra.mxu0 %v623_v8  ;;  %558 = vmatpush3.bf16.msra.mxu1 %v629_v33  ;;  %v55_v8 = vld [vmem:[%s888_s4 + $0x3] ss:$0 sm:$0xff] }
  0x35   :  { %559 = vmatprep.subr.bf16.mxu1 %v630_v34  ;;  %584 = vmatprep.subr.bf16.mxu0 %v729_v6  ;;  %v57_v34 = vld [vmem:[%s888_s4 + $0x5] ss:$0 sm:$0xff] }
  0x37   :  { %528 = vmatmul.mubr.msk.bf16.vlgmr.msra.gmra.mrb[0].mxu0 %vm118_vm0, %v49_v10 }
  0x38   :  { %560 = vmatpush3.bf16.msra.mxu1 %v631_v35  ;;  %585 = vmatpush3.bf16.msra.mxu0 %v640_v15 }
  0x39   :  { %561 = vmatprep.subr.bf16.mxu1 %v632_v36  ;;  %586 = vmatprep.subr.bf16.mxu0 %v729_v6 }
  0x3a   :  { %600 = vmatprep.mubr.msk.bf16.mxu0 %vm730_vm1, %v729_v6 }
  0x3c   :  { %562 = vmatpush3.bf16.msra.mxu1 %v633_v37 }
  0x3d   :  { %563 = vmatprep.subr.bf16.mxu1 %v634_v38 }
  0x40   :  { %564 = vmatpush3.bf16.msra.mxu1 %v635_v39  ;;  %v58_v39 = vld [vmem:[%s888_s4 + $0x6] ss:$0 sm:$0xff] }
  0x41   :  { %565 = vmatprep.subr.bf16.mxu1 %v636_v40 }
  0x44   :  { %566 = vmatpush3.bf16.msra.mxu1 %v637_v41 }
  0x45   :  { %567 = vmatprep.subr.bf16.mxu1 %v638_v42 }
  0x48   :  { %568 = vmatpush3.bf16.msra.mxu1 %v639_v43 }
 0x10a   :  { %v156_v18 = vpop.f32.mrb[0].mxu0 }
 0x10b   :  { %v157_v19 = vadd.f32 %v156_v18, %v71_v16  ;;  %v158_v20 = vpop.f32.mrb[1].mxu0  ;;  %v641_v16 = vld [vmem:[%s887_s3 + $0x8] sm:$0xff]   ;;  %v643_v18 = vld [vmem:[%s887_s3 + $0x18] sm:$0xff]  }
 0x10c   :  { %v159_v21 = vadd.f32 %v158_v20, %v75_v17  ;;  %v160_v22 = vpop.f32.mrb[2].mxu0  ;;  %587 = vmatpush3.bf16.msra.mxu0 %v641_v16  ;;  %v642_v17 = vld [vmem:[%s887_s3 + $0x10] sm:$0xff]   ;;  %v645_v20 = vld [vmem:[%s887_s3 + $0x28] sm:$0xff]  }
 0x10d   :  { %v161_v23 = vpop.f32.mrb[3].mxu0  ;;  %v167_v25 = vmul.f32 %v157_v19, %v157_v19  ;;  %588 = vmatprep.subr.bf16.mxu0 %v729_v6  ;;  %v647_v22 = vld [vmem:[%s887_s3 + $0x38] sm:$0xff]  }
 0x10e   :  { %v163_v24 = vadd.f32 %v159_v21, %v157_v19  ;;  %v168_v26 = vmul.f32 %v159_v21, %v159_v21 }
 0x110   :  { %164 = vadd.xlane.f32.xlu0 %v163_v24  ;;  %v169_v27 = vadd.f32 %v168_v26, %v167_v25  ;;  %589 = vmatpush3.bf16.msra.mxu0 %v642_v17 }
 0x111   :  { %590 = vmatprep.subr.bf16.mxu0 %v729_v6 }
 0x114   :  { %170 = vadd.xlane.f32.xlu0 %v169_v27  ;;  %591 = vmatpush3.bf16.msra.mxu0 %v643_v18 }
 0x115   :  { %592 = vmatprep.subr.bf16.mxu0 %v729_v6 }
 0x19d   :  { %v165_v44 = vpop.xlane.xlu0 %164 }
 0x19e   :  { %v166_v45 = vmul.f32 0.005, %v165_v44 }
 0x1a0   :  { %v173_v47 = vmul.f32 %v166_v45, %v166_v45  ;;  %v175_v53 = vsub.f32 %v157_v19, %v166_v45  ;;  %v176_v54 = vsub.f32 %v159_v21, %v166_v45  ;;  %v644_v19 = vld [vmem:[%s887_s3 + $0x20] sm:$0xff]   ;;  %v646_v21 = vld [vmem:[%s887_s3 + $0x30] sm:$0xff]  }
 0x1a1   :  { %v171_v46 = vpop.xlane.xlu0 %170  ;;  %593 = vmatpush3.bf16.msra.mxu0 %v644_v19 }
 0x1a2   :  { %v172_v48 = vmul.f32 0.005, %v171_v46  ;;  %594 = vmatprep.subr.bf16.mxu0 %v729_v6 }
 0x1a4   :  { %v174_v49 = vsub.f32 %v172_v48, %v173_v47 }
 0x1a5   :  { %595 = vmatpush3.bf16.msra.mxu0 %v645_v20 }
 0x1a6   :  { %v177_v50 = vadd.f32 1e-05, %v174_v49  ;;  %596 = vmatprep.subr.bf16.mxu0 %v729_v6 }
 0x1a8   :  { %648 = vrsqrt.f32 %v177_v50 }
 0x1a9   :  { %597 = vmatpush3.bf16.msra.mxu0 %v646_v21 }
 0x1aa   :  { %598 = vmatprep.subr.bf16.mxu0 %v729_v6 }
 0x1ad   :  { %599 = vmatpush3.bf16.msra.mxu0 %v647_v22 }
 0x1b2   :  { %v649_v57 = vpop.eup %648 }
 0x1b3   :  { %v180_v58 = vmul.f32 %v649_v57, %v176_v54  ;;  %v179_v61 = vmul.f32 %v649_v57, %v175_v53 }
 0x1b5   :  { %v193_v62 = vmul.f32 %v189_v56, %v180_v58  ;;  %v192_v63 = vmul.f32 %v185_v55, %v179_v61 }
 0x1b7   :  { %v206_v0 = vadd.f32 %v202_v60, %v193_v62  ;;  %v205_v1 = vadd.f32 %v198_v59, %v192_v63 }
 0x1b9   :  { %v208_v2 = vmax.f32 %v206_v0, 0.0  ;;  %v207_v3 = vmax.f32 %v205_v1, 0.0 }
 0x1bb   :  { %v210_v4 = vpack.c.bf16 %v208_v2, %v208_v2  ;;  %v209_v5 = vpack.c.bf16 %v207_v3, %v207_v3 }
 0x1bd   :  { %371 = vmatprep.mubr.bf16.mxu1 %v210_v4 }
 0x1be   :  { %372 = vmatmul.mubr.bf16.vlgmr.msra.gmra.mrb[0].mxu1 %v209_v5 }
 0x291   :  { %v569_v7 = vpop.f32.mrb[0].mxu1 }
 0x292   :  { %v570_v9 = vpop.f32.mrb[1].mxu1 }
 0x293   :  { %v571_v10 = vadd.f32 %v570_v9, %v569_v7  ;;  %v572_v11 = vpop.f32.mrb[2].mxu1 }
 0x294   :  { %v573_v12 = vpop.f32.mrb[3].mxu1 }
 0x295   :  { %v374_v13 = vadd.f32 %v571_v10, %v55_v8 }
 0x297   :  { %379 = vadd.xlane.f32.xlu1 %v374_v13  ;;  %v382_v14 = vmul.f32 %v374_v13, %v374_v13 }
 0x29b   :  { %383 = vadd.xlane.f32.xlu1 %v382_v14 }
 0x324   :  { %v380_v23 = vpop.xlane.xlu1 %379 }
 0x325   :  { %v381_v24 = vmul.f32 0.01, %v380_v23 }
 0x327   :  { %v386_v26 = vmul.f32 %v381_v24, %v381_v24  ;;  %v388_v30 = vsub.f32 %v374_v13, %v381_v24 }
 0x328   :  { %v384_v25 = vpop.xlane.xlu1 %383 }
 0x329   :  { %v385_v27 = vmul.f32 0.01, %v384_v25 }
 0x32b   :  { %v387_v28 = vsub.f32 %v385_v27, %v386_v26 }
 0x32d   :  { %v389_v29 = vadd.f32 1e-05, %v387_v28 }
 0x32f   :  { %650 = vrsqrt.f32 %v389_v29 }
 0x339   :  { %v651_v31 = vpop.eup %650 }
 0x33a   :  { %v391_v33 = vmul.f32 %v651_v31, %v388_v30 }
 0x33c   :  { %v392_v35 = vmul.f32 %v391_v33, %v56_v32 }
 0x33e   :  { %v393_v36 = vadd.f32 %v392_v35, %v57_v34 }
 0x340   :  { %v394_v37 = vmax.f32 %v393_v36, 0.0 }
 0x342   :  { %v395_v38 = vpack.c.bf16 %v394_v37, %v394_v37 }
 0x344   :  { %601 = vmatmul.mubr.bf16.vlgmr.msra.gmra.mrb[4].mxu0 %v395_v38 }
 0x417   :  { %v494_v40 = vpop.f32.mrb[4].mxu0 }
 0x418   :  { %v495_v41 = vadd.f32 %v494_v40, %v58_v39  ;;  %v602_v42 = vpop.f32.mrb[5].mxu0 }
 0x419   :  { %v497_v43 = vpop.f32.mrb[6].mxu0 }
 0x41a   :  { %v603_v44 = vpop.f32.mrb[7].mxu0  ;;  %501 = vst.msk [vmem:[#allocation7] sm:$0xff] %vm500_vm2, %v495_v41 }
 0x41b   :  { %707 = shalt.err (!%p704_p6)
}
 0x41c   :  { %s708_s4 = scalar_lea.hbm %s889_s5, 128 }
 0x41d   :  { %p709_p7 = scmp.ne.s32.totalorder %s889_s5, %s708_s4  ;;  %p712_p8 = scmp.lt.u32.totalorder %s708_s4, %s889_s5 }
 0x41f   :  { %p714_p9 = pnand %p712_p8, %p709_p7 }
 0x421   :  { %717 = shalt.err (!%p714_p9)
}
 0x422   :  { %511 = dma.vmem_to_hbm [thread:$0]  %s509_s1, 128, %s889_s5, [#allocation4]  }
 0x423   :  { %722 = dma.done.wait [#allocation4], 128  }
 0x424   :  { %723 = vsyncadd [#allocation4], 4294967168 }
 0x425   :  { %515 = vsyncpa [#allocation3], 1 }
 0x426   :  { %516 = vsyncpa [#allocation6], 1 }
 0x427   :  { %517 = vsyncpa [#allocation4], 1 }

</bundles_post_ra>
